<compile_context>
chip_gen: v7x
topology: tpu7x:2x2x1
jax: 0.10.0
libtpu: 0.0.40
codegen_flags: <defaults>
</compile_context>

<pallas_src>
import functools

import numpy as np

import jax
import jax.numpy as jnp
from jax import lax
from jax.experimental import pallas as pl
from jax.experimental.pallas import tpu as pltpu


_LANE = 128


def _cdiv(a, b):
    return -(-a // b)


def _round_down(x, m):
    return (x // m) * m


# ----------------------------------------------------------------------------
# Pallas kernel: pad-mask rows of token ids (the `tensorize` / pad_3d hot path)
# ----------------------------------------------------------------------------
def _pad_mask_kernel(len_ref, tok_ref, out_ref, *, pad_idx, col_tile):
    # len_ref : (RT, 1)  int32          -- #valid tokens per row (0 => all pad)
    # tok_ref : (RT, CT) int16 or int32 -- dense ids, -1 beyond valid extent
    # out_ref : (RT, CT) int32
    col0 = pl.program_id(1) * col_tile
    col_ids = col0 + lax.broadcasted_iota(jnp.int32, out_ref.shape, 1)
    valid = col_ids < len_ref[...]                     # (RT,1) broadcasts over CT
    out_ref[...] = jnp.where(valid, tok_ref[...].astype(jnp.int32),
                             jnp.int32(pad_idx))


def _choose_tiles(n_rows, n_cols, in_itemsize, out_itemsize, row_align,
                  target_block_bytes=8 << 20, min_grid_steps=8):
    """Pick (row_tile, col_tile).

    Blocks use the "full array dim" escape whenever possible (so no host
    padding or post-kernel slicing is ever needed); otherwise tiles are
    (row_align, 128)-aligned and Pallas masks the partial boundary blocks.
    The row tile is shrunk (never below row_align) until the grid has enough
    steps to keep both v7x TensorCores busy and the DMA pipeline primed.
    """
    per_elem = in_itemsize + out_itemsize
    min_rows = min(n_rows, row_align)

    # Column tile: full row width unless even a minimal-height block blows the
    # budget; then fall back to a 128-multiple tile (partial last block OK).
    if n_cols <= _LANE or n_cols * min_rows * per_elem <= target_block_bytes:
        col_tile = n_cols
    else:
        col_tile = _round_down(target_block_bytes // (min_rows * per_elem), _LANE)
        col_tile = max(_LANE, min(col_tile, _round_down(n_cols, _LANE)))
    col_steps = _cdiv(n_cols, col_tile)

    if n_rows <= row_align:
        return n_rows, col_tile                         # full-dim escape

    row_tile = _round_down(target_block_bytes // (col_tile * per_elem), row_align)
    row_tile = max(row_align, min(row_tile, _round_down(n_rows, row_align)))
    while row_tile > row_align and _cdiv(n_rows, row_tile) * col_steps < min_grid_steps:
        row_tile = max(row_align, _round_down(row_tile // 2, row_align))
    return row_tile, col_tile


def pad_rows_pallas(row_lens, tokens, pad_idx, row_tile, col_tile):
    """row_lens: int32 [N, 1]; tokens: int16/int32 [N, T] (-1 beyond extent).
    Returns padded int32 [N, T] with pad_idx beyond each row's length."""
    N, T = tokens.shape
    grid = (_cdiv(N, row_tile), _cdiv(T, col_tile))

    in_b = tokens.dtype.itemsize
    # double-buffered token-in + out blocks + lens block, with 2x headroom
    vmem_need = 2 * (row_tile * col_tile * (in_b + 4) + row_tile * 4)
    vmem_limit = int(min(64 << 20, max(2 * vmem_need, 16 << 20)))

    kernel = functools.partial(_pad_mask_kernel, pad_idx=int(pad_idx),
                               col_tile=int(col_tile))
    # In-place masking when dtypes match (int32 path): halves HBM allocation.
    io_alias = {1: 0} if tokens.dtype == jnp.int32 else {}

    return pl.pallas_call(
        kernel,
        out_shape=jax.ShapeDtypeStruct((N, T), jnp.int32),
        grid=grid,
        in_specs=[
            pl.BlockSpec((row_tile, 1), lambda i, j: (i, 0)),          # lengths
            pl.BlockSpec((row_tile, col_tile), lambda i, j: (i, j)),   # tokens
        ],
        out_specs=pl.BlockSpec((row_tile, col_tile), lambda i, j: (i, j)),
        input_output_aliases=io_alias,
        compiler_params=pltpu.CompilerParams(
            dimension_semantics=("parallel", "parallel"),
            vmem_limit_bytes=vmem_limit),
    )(row_lens, tokens)


# ----------------------------------------------------------------------------
# Host-side module mirroring String2DListTensorizerScriptImpl
# ----------------------------------------------------------------------------
class String2DListTensorizerPallas:
    def __init__(self, vocab_tokens, pad_token="__PAD__", unk_token="__UNK__",
                 force_int32_tokens=False):
        # Deterministic in-script vocab (ScriptVocabulary stand-in).
        self.itos = list(vocab_tokens)
        self.stoi = {t: i for i, t in enumerate(self.itos)}
        self.pad_idx = self.stoi[pad_token]
        self.unk_idx = self.stoi[unk_token]
        use_i16 = (len(self.itos) <= 32767) and not force_int32_tokens
        self._stage_np_dtype = np.int16 if use_i16 else np.int32
        self._row_align = 16 if use_i16 else 8   # (16,128) packed tiles for i16

    # TODO(synk): string vocab lookup has no Pallas equivalent; done on host.
    def numberize(self, tokens_2d):
        token_indices = [[self.stoi.get(t, self.unk_idx) for t in row]
                         for row in tokens_2d]
        token_lengths = [len(row) for row in token_indices]
        return token_indices, token_lengths, len(token_indices)

    def forward(self, inputs):
        tokens_3d, seq_lens_2d, seq_lens_1d = [], [], []
        for rows in inputs:
            tok, lens, n = self.numberize(rows)
            tokens_3d.append(tok)
            seq_lens_2d.append(lens)
            seq_lens_1d.append(n)

        B = len(inputs)
        R = max(seq_lens_1d) if B else 0
        T = 0
        for lens in seq_lens_2d:
            if lens:
                T = max(T, max(lens))
        lens_out = jnp.asarray(np.asarray(seq_lens_1d, dtype=np.int32))

        if B == 0 or R == 0 or T == 0:
            # Nothing to mask; degenerate (possibly zero-sized) output.
            return jnp.full((B, R, T), self.pad_idx, dtype=jnp.int32), lens_out

        # Flat row layout [B*R, T] at the EXACT logical extent: no host padding
        # of N or T, and no post-kernel slice.  Rows beyond a batch element's
        # valid rows get length 0 and are filled with pad_idx by the kernel.
        N = B * R
        tok_np = np.full((N, T), -1, dtype=self._stage_np_dtype)  # -1: never a real id
        len_np = np.zeros((N, 1), dtype=np.int32)
        for b in range(B):
            base = b * R
            for r, row in enumerate(tokens_3d[b]):
                if row:
                    tok_np[base + r, :len(row)] = row
                len_np[base + r, 0] = len(row)

        row_tile, col_tile = _choose_tiles(N, T, tok_np.itemsize, 4,
                                           self._row_align)
        padded = pad_rows_pallas(jnp.asarray(len_np), jnp.asarray(tok_np),
                                 self.pad_idx, row_tile, col_tile)

        # Contiguous leading-dim split: free metadata reshape, no copy.
        return padded.reshape(B, R, T), lens_out


# ----------------------------------------------------------------------------
# Demo / correctness check
# ----------------------------------------------------------------------------
if __name__ == "__main__":
    vocab = ["__UNK__", "__PAD__", "hello", "world", "foo", "bar", "baz",
             "qux", "alpha", "beta", "gamma", "delta"]
    words = vocab[2:] + ["oov_token"]          # candidate tokens incl. one OOV

    # Deterministic ragged string inputs derived from PRNGKey(0).
    def make_batch(key, batch, max_rows, max_toks):
        ks = jax.random.split(key, 3)
        n_rows = np.asarray(jax.random.randint(ks[0], (batch,), 1, max_rows + 1))
        n_toks = np.asarray(jax.random.randint(ks[1], (batch, max_rows),
                                               1, max_toks + 1))
        ids = np.asarray(jax.random.randint(ks[2], (batch, max_rows, max_toks),
                                            0, len(words)))
        return [[[words[ids[b, r, t]] for t in range(int(n_toks[b, r]))]
                 for r in range(int(n_rows[b]))] for b in range(batch)]

    key = jax.random.PRNGKey(0)
    k1, k2 = jax.random.split(key)
    small = make_batch(k1, batch=2, max_rows=3, max_toks=5)     # tiny, grid (1,1)
    medium = make_batch(k2, batch=3, max_rows=12, max_toks=40)  # multi-tile grid

    def reference(mod, inputs):
        # Pure-Python pad_3d mirroring pytext semantics.
        B = len(inputs)
        R = max(len(rows) for rows in inputs)
        T = max(len(row) for rows in inputs for row in rows)
        ref = np.full((B, R, T), mod.pad_idx, dtype=np.int32)
        for b, rows in enumerate(inputs):
            for r, row in enumerate(rows):
                for c, tok in enumerate(row):
                    ref[b, r, c] = mod.stoi.get(tok, mod.unk_idx)
        lens = np.asarray([len(rows) for rows in inputs], dtype=np.int32)
        return ref, lens

    mods = [
        String2DListTensorizerPallas(vocab),                           # int16 staging path
        String2DListTensorizerPallas(vocab, force_int32_tokens=True),  # int32 + aliased output
    ]
    for mod in mods:
        for inputs in (small, medium):
            padded, lens = jax.block_until_ready(mod.forward(inputs))
            ref, ref_lens = reference(mod, inputs)
            assert padded.shape == ref.shape, (padded.shape, ref.shape)
            assert lens.shape == ref_lens.shape, (lens.shape, ref_lens.shape)
            assert np.array_equal(np.asarray(padded), ref)
            assert np.array_equal(np.asarray(lens), ref_lens)

    print("KERNEL_OK")
</pallas_src>

<mosaic_0001>
module attributes {stable_mosaic.version = 11 : i64} {
  func.func @_pad_mask_kernel(%arg0: i32, %arg1: i32, %arg2: memref<6x1xi32, #tpu.memory_space<vmem>>, %arg3: memref<6x5xi16, #tpu.memory_space<vmem>>, %arg4: memref<6x5xi32, #tpu.memory_space<vmem>>) attributes {dimension_semantics = [#tpu.dimension_semantics<parallel>, #tpu.dimension_semantics<parallel>], iteration_bounds = array<i64: 1, 1>, scalar_prefetch = 0 : i64, scratch_operands = 0 : i64, tpu.core_type = #tpu.core_type<tc>, window_params = [{transform_indices = @transform_0, window_bounds = array<i64: 6, 1>}, {transform_indices = @transform_1, window_bounds = array<i64: 6, 5>}, {transform_indices = @transform_2, window_bounds = array<i64: 6, 5>}]} {
    %c5_i32 = arith.constant 5 : i32
    %0 = arith.muli %arg1, %c5_i32 : i32
    %1 = tpu.iota {dimensions = array<i32: 1>} : vector<6x5xi32>
    %2 = vector.broadcast %0 : i32 to vector<6x5xi32>
    %3 = arith.addi %2, %1 : vector<6x5xi32>
    %c0 = arith.constant 0 : index
    %c0_0 = arith.constant 0 : index
    %4 = vector.load %arg2[%c0, %c0_0] : memref<6x1xi32, #tpu.memory_space<vmem>>, vector<6x1xi32>
    %5 = vector.broadcast %4 : vector<6x1xi32> to vector<6x5xi32>
    %6 = arith.cmpi slt, %3, %5 : vector<6x5xi32>
    %c0_1 = arith.constant 0 : index
    %c0_2 = arith.constant 0 : index
    %7 = vector.load %arg3[%c0_1, %c0_2] : memref<6x5xi16, #tpu.memory_space<vmem>>, vector<6x5xi16>
    %8 = arith.extsi %7 : vector<6x5xi16> to vector<6x5xi32>
    %c1_i32 = arith.constant 1 : i32
    %9 = vector.broadcast %c1_i32 : i32 to vector<6x5xi32>
    %10 = arith.select %6, %8, %9 : vector<6x5xi1>, vector<6x5xi32>
    %c0_3 = arith.constant 0 : index
    %c0_4 = arith.constant 0 : index
    %11 = vector.load %arg4[%c0_3, %c0_4] : memref<6x5xi32, #tpu.memory_space<vmem>>, vector<6x5xi32>
    tpu.vector_store %arg4[%c0_3, %c0_4], %10 {strides = array<i32>} : memref<6x5xi32, #tpu.memory_space<vmem>>, vector<6x5xi32>,
    return
  }
  func.func @transform_0(%arg0: i32, %arg1: i32) -> (i32, i32) {
    %c0_i32 = arith.constant 0 : i32
    %c0_i32_0 = arith.constant 0 : i32
    return %arg0, %c0_i32 : i32, i32
  }
  func.func @transform_1(%arg0: i32, %arg1: i32) -> (i32, i32) {
    %c0_i32 = arith.constant 0 : i32
    return %arg0, %arg1 : i32, i32
  }
  func.func @transform_2(%arg0: i32, %arg1: i32) -> (i32, i32) {
    %c0_i32 = arith.constant 0 : i32
    return %arg0, %arg1 : i32, i32
  }
}

</mosaic_0001>

<bundles_post_ra>
// kernel: tpu_custom_call.1
= control target key start
LH: loop header
LB: loop body
LE: loop exit
PB: predicated region body
PF: predicated region fallthrough
CT: control target
= control target key end

     0   :  { %v68_v1 = vmov 0   ;;  %s103_s0 = inlined_call_operand.vmem [shape: s32[6,1], index: 0, kind: input, shape index: {}]   ;;  %s104_s1 = inlined_call_operand.vmem [shape: s16[6,5], index: 1, kind: input, shape index: {}]   ;;  %s105_s2 = inlined_call_operand.hbm [shape: s32[6,5], index: 2, kind: output, shape index: {}]  }
   0x1   :  { %v17_v0 = vld [vmem:[%s103_s0] sm:$0x3f]  ;;  %43 = vset.pattern.permute.xlu0 %v68_v1 }
   0x2   :  { %7 = vsyncpa [#allocation3], 0  ;;  %19 = vperm.xlu0 %43, %v17_v0   ;;  %v13_v2 = vlaneseq  ;;  %v22_v3 = vld [vmem:[%s104_s1] sm:$0x7]  ;;  %s69_s13 = smov [#allocation2]   ;;  %vm25_vm0 = vcmask 37888  }
   0x3   :  { %v23_v5 = vunpack.c.l.b16 %v22_v3  ;;  %s33_s14 = sshll.u32 %s69_s13, 4  ;;  %s34_s14 = int_to_ptr.vmem [resolvable:$true] %s33_s14 }
   0x4   :  { %v14_v4 = vand.u32 127, %v13_v2  ;;  %s44_s0 = scalar_lea.vmem %s34_s14, 128  ;;  %p49_p1 = scmp.lt.s32.totalorder %s34_s14, %s34_s14 }
   0x5   :  { %p45_p0 = scmp.ne.s32.totalorder %s34_s14, %s44_s0  ;;  %p50_p2 = scmp.lt.s32.totalorder %s44_s0, %s44_s0 }
   0x7   :  { %p51_p3 = por %p50_p2, %p49_p1 }
   0x9   :  { %p52_p4 = pnand %p51_p3, %p45_p0 }
  0x81   :  { %v20_v6 = vpop.permute.xlu0 %19 }
  0x82   :  { %vm21_vm1 = vcmp.lt.s32.totalorder %v14_v4, %v20_v6 }
  0x83   :  { %v24_v7 = vsel %vm21_vm1, %v23_v5, 1 }
  0x84   :  { %26 = vst.msk [vmem:[#allocation2] sm:$0x3f] %vm25_vm0, %v24_v7 }
  0x85   :  { %55 = shalt.err (!%p52_p4)
}
  0x86   :  { %s56_s1 = scalar_lea.hbm %s105_s2, 128 }
  0x87   :  { %p57_p5 = scmp.ne.s32.totalorder %s105_s2, %s56_s1  ;;  %p60_p6 = scmp.lt.u32.totalorder %s56_s1, %s105_s2 }
  0x89   :  { %p62_p7 = pnand %p60_p6, %p57_p5 }
  0x8b   :  { %65 = shalt.err (!%p62_p7)
}
  0x8c   :  { %36 = dma.vmem_to_hbm [thread:$0]  %s34_s14, 128, %s105_s2, [#allocation3]  }
  0x8d   :  { %66 = dma.done.wait [#allocation3], 128  }
  0x8e   :  { %67 = vsyncadd [#allocation3], 4294967168 }
  0x8f   :  { %40 = vsyncpa [#allocation3], 1 }

</bundles_post_ra>
